<compile_context>
chip_gen: v7x
topology: tpu7x:2x2x1
jax: 0.10.0
libtpu: 0.0.40
codegen_flags: <defaults>
</compile_context>

<pallas_src>
import functools

import jax
import jax.numpy as jnp
from jax.experimental import pallas as pl
from jax.experimental.pallas import tpu as pltpu


def _round_up(n, m):
    return ((n + m - 1) // m) * m


def _cdiv(a, b):
    return -(-a // b)


def _lyapunov_kernel(x_ref, goal_ref, wblk_ref, b1p_ref, w2p_ref, mpsd_ref,
                     b2adj_ref, out_ref, xc_ref, *, d, s1, s2):
    x = x_ref[...]                                            # (TB, D)

    # Assemble the fused LHS [x - x*, x] (TB, 2D) in VMEM scratch so ONE MXU matmul against the
    # block-diagonal weight [[Q, 0], [0, W1]] reproduces x0 @ Q and x @ W1 exactly.
    xc_ref[:, :d] = x - goal_ref[...]
    xc_ref[:, d:] = x
    y = jnp.dot(xc_ref[...], wblk_ref[...],
                preferred_element_type=jnp.float32)           # (TB, D + W)

    # V_psd = |x0 @ Q|_1 : columns [0, D); the mask zeroes the net columns exactly.
    v_psd = jnp.sum(jnp.abs(y) * mpsd_ref[...], axis=-1, keepdims=True)   # (TB, 1)

    # net(x) - net(x*): layer-1 pre-activations are columns [D, D+W); b1 / W2-row are zero-padded
    # over the psd columns so no lane slicing is needed.  Layer 2 (output width 1) runs as a VPU
    # multiply + cross-lane reduce; net(goal) is folded into b2_adj in the wrapper.
    h = jnp.maximum(y + b1p_ref[...], 0.0)                    # (TB, D + W)
    net_delta = jnp.sum(h * w2p_ref[...], axis=-1, keepdims=True) + b2adj_ref[0]

    # (V_psd + nn_scale * |net_delta|) * scale, with scales pre-folded into s1, s2.
    out_ref[...] = s1 * v_psd + s2 * jnp.abs(net_delta)


def neural_network_lyapunov(x, goal_state, R, W1, b1, W2, b2, *,
                            eps, nn_scale=1.0, scale=1.0, block_b=2048):
    """x: (B, x_dim) f32; returns V: (B, 1) f32."""
    B, D = x.shape
    W = W1.shape[1]
    f32 = jnp.float32
    x = x.astype(f32)
    goal2d = goal_state.reshape(1, D).astype(f32)
    R = R.astype(f32)
    W1 = W1.astype(f32)
    b1 = b1.reshape(1, W).astype(f32)
    W2 = W2.reshape(W, 1).astype(f32)
    b2 = b2.reshape(1, 1).astype(f32)

    # ---- batch-invariant precompute (plain XLA, hoisted out of the kernel) ----
    Q = eps * jnp.eye(D, dtype=f32) + R.T @ R                         # (D, D)
    net_g = jnp.maximum(goal2d @ W1 + b1, 0.0) @ W2 + b2              # net(goal), (1, 1)
    b2_adj = jnp.reshape(b2 - net_g, (1,))                            # folded into layer-2 bias

    # Block-diagonal fused weight and zero-padded per-lane params / mask.
    wblk = jnp.zeros((2 * D, D + W), f32)
    wblk = wblk.at[:D, :D].set(Q).at[D:, D:].set(W1)                  # (2D, D+W)
    zD = jnp.zeros((1, D), f32)
    b1_pad = jnp.concatenate([zD, b1], axis=1)                        # (1, D+W)
    w2_pad = jnp.concatenate([zD, W2.reshape(1, W)], axis=1)          # (1, D+W)
    m_psd = jnp.concatenate([jnp.ones((1, D), f32),
                             jnp.zeros((1, W), f32)], axis=1)         # (1, D+W)

    # ---- batch tiling: big tiles (amortize per-step overhead); >=2 steps for large batches so
    # ---- the "parallel" axis can shard across v7x's 2 TensorCores (no-op on v5e/v6e). ----
    B8 = _round_up(B, 8)
    TB = min(_round_up(int(block_b), 8), B8)
    if B8 >= 512 and _cdiv(B8, TB) < 2:
        TB = _round_up(_cdiv(B8, 2), 8)
    B_pad = _round_up(B, TB)
    if B_pad != B:
        x = jnp.pad(x, ((0, B_pad - B), (0, 0)))                      # zero rows, sliced off later
    grid = (B_pad // TB,)

    kern = functools.partial(_lyapunov_kernel, d=D,
                             s1=float(scale), s2=float(nn_scale) * float(scale))

    flops = int(2 * B_pad * (2 * D) * (D + W) + 8 * B_pad * (D + W))
    bytes_accessed = int(4 * (B_pad * D + 2 * D * (D + W) + 3 * (D + W) + D + 1 + B_pad))

    out = pl.pallas_call(
        kern,
        out_shape=jax.ShapeDtypeStruct((B_pad, 1), f32),
        grid=grid,
        in_specs=[
            pl.BlockSpec((TB, D), lambda i: (i, 0)),            # x: tiled over batch
            pl.BlockSpec((1, D), lambda i: (0, 0)),             # goal (VMEM resident)
            pl.BlockSpec((2 * D, D + W), lambda i: (0, 0)),     # block-diag [Q, W1] (resident)
            pl.BlockSpec((1, D + W), lambda i: (0, 0)),         # b1 zero-padded (resident)
            pl.BlockSpec((1, D + W), lambda i: (0, 0)),         # W2 row zero-padded (resident)
            pl.BlockSpec((1, D + W), lambda i: (0, 0)),         # L1 column mask (resident)
            pl.BlockSpec(memory_space=pltpu.MemorySpace.SMEM),  # b2_adj scalar
        ],
        out_specs=pl.BlockSpec((TB, 1), lambda i: (i, 0)),
        scratch_shapes=[pltpu.VMEM((TB, 2 * D), f32)],          # fused-LHS assembly buffer
        compiler_params=pltpu.CompilerParams(
            dimension_semantics=("parallel",)),
        cost_estimate=pl.CostEstimate(flops=flops, transcendentals=0,
                                      bytes_accessed=bytes_accessed),
    )(x, goal2d, wblk, b1_pad, w2_pad, m_psd, b2_adj)

    return out[:B]


def _reference(x, goal_state, R, W1, b1, W2, b2, *, eps, nn_scale=1.0, scale=1.0):
    Q = eps * jnp.eye(x.shape[-1], dtype=jnp.float32) + R.T @ R
    x0 = x - goal_state[None, :]
    Rx = x0 @ Q
    V_psd = jnp.sum(jnp.maximum(Rx, 0.0) + jnp.maximum(-Rx, 0.0), axis=-1, keepdims=True)

    def net(z):
        return jnp.maximum(z @ W1 + b1, 0.0) @ W2 + b2

    d = net(x) - net(goal_state[None, :])
    V_net1 = jnp.maximum(d, 0.0) + jnp.maximum(-d, 0.0)
    return (V_psd + nn_scale * V_net1) * scale


if __name__ == "__main__":
    # Small shapes implied by the module: batch=8, x_dim=16, R_rows=8, width=32, depth=2.
    B, D, R_ROWS, WIDTH = 8, 16, 8, 32
    R_SCALE, EPS, NN_SCALE, SCALE = 0.5, 0.01, 1.0, 1.0

    key = jax.random.PRNGKey(0)
    kx, kg, kR, kW1, kb1, kW2, kb2 = jax.random.split(key, 7)

    x = jax.random.normal(kx, (B, D), dtype=jnp.float32)
    goal_state = jax.random.normal(kg, (D,), dtype=jnp.float32) * 0.1
    # R = (rand - 0.5) * R_scale   (synthetic init, matching __init__)
    R = (jax.random.uniform(kR, (R_ROWS, D), dtype=jnp.float32) - 0.5) * R_SCALE
    # FFNet(x_dim, 1, depth=2, width) parameters (nn.Linear-style uniform init).
    lim1 = 1.0 / jnp.sqrt(D)
    W1 = jax.random.uniform(kW1, (D, WIDTH), minval=-lim1, maxval=lim1, dtype=jnp.float32)
    b1 = jax.random.uniform(kb1, (1, WIDTH), minval=-lim1, maxval=lim1, dtype=jnp.float32)
    lim2 = 1.0 / jnp.sqrt(WIDTH)
    W2 = jax.random.uniform(kW2, (WIDTH, 1), minval=-lim2, maxval=lim2, dtype=jnp.float32)
    b2 = jax.random.uniform(kb2, (1, 1), minval=-lim2, maxval=lim2, dtype=jnp.float32)

    V = neural_network_lyapunov(x, goal_state, R, W1, b1, W2, b2,
                                eps=EPS, nn_scale=NN_SCALE, scale=SCALE)
    V = jax.block_until_ready(V)
    V_ref = _reference(x, goal_state, R, W1, b1, W2, b2,
                       eps=EPS, nn_scale=NN_SCALE, scale=SCALE)
    assert V.shape == (B, 1)
    assert jnp.allclose(V, V_ref, rtol=1e-5, atol=1e-5), (V, V_ref)

    # Also exercise the gridded path (B not a multiple of the tile; 2 grid steps for the
    # v7x megacore split logic).
    B2 = 1030
    x2 = jax.random.normal(jax.random.PRNGKey(1), (B2, D), dtype=jnp.float32)
    V2 = neural_network_lyapunov(x2, goal_state, R, W1, b1, W2, b2,
                                 eps=EPS, nn_scale=NN_SCALE, scale=SCALE)
    V2 = jax.block_until_ready(V2)
    V2_ref = _reference(x2, goal_state, R, W1, b1, W2, b2,
                        eps=EPS, nn_scale=NN_SCALE, scale=SCALE)
    assert V2.shape == (B2, 1)
    assert jnp.allclose(V2, V2_ref, rtol=1e-5, atol=1e-5)

    # TODO(synk): a batch-on-lanes (transposed, lane-dense output) variant and bf16 MXU operands
    # are possible further wins for very large B, but need transposed upstream x / looser
    # numerical tolerance, so they are intentionally not applied here.
    print("KERNEL_OK")
</pallas_src>

<mosaic_0001>
module attributes {stable_mosaic.version = 11 : i64} {
  func.func @_lyapunov_kernel(%arg0: i32, %arg1: memref<8x16xf32, #tpu.memory_space<vmem>>, %arg2: memref<1x16xf32, #tpu.memory_space<vmem>>, %arg3: memref<32x48xf32, #tpu.memory_space<vmem>>, %arg4: memref<1x48xf32, #tpu.memory_space<vmem>>, %arg5: memref<1x48xf32, #tpu.memory_space<vmem>>, %arg6: memref<1x48xf32, #tpu.memory_space<vmem>>, %arg7: memref<1xf32, #tpu.memory_space<smem>>, %arg8: memref<8x1xf32, #tpu.memory_space<vmem>>, %arg9: memref<8x32xf32, #tpu.memory_space<vmem>>) attributes {dimension_semantics = [#tpu.dimension_semantics<parallel>], iteration_bounds = array<i64: 1>, scalar_prefetch = 0 : i64, scratch_operands = 1 : i64, tpu.core_type = #tpu.core_type<tc>, window_params = [{transform_indices = @transform_0, window_bounds = array<i64: 8, 16>}, {pipeline_mode = #tpu.pipeline_mode<synchronous>, transform_indices = @transform_1, window_bounds = array<i64: 1, 16>}, {pipeline_mode = #tpu.pipeline_mode<synchronous>, transform_indices = @transform_2, window_bounds = array<i64: 32, 48>}, {pipeline_mode = #tpu.pipeline_mode<synchronous>, transform_indices = @transform_3, window_bounds = array<i64: 1, 48>}, {pipeline_mode = #tpu.pipeline_mode<synchronous>, transform_indices = @transform_4, window_bounds = array<i64: 1, 48>}, {pipeline_mode = #tpu.pipeline_mode<synchronous>, transform_indices = @transform_5, window_bounds = array<i64: 1, 48>}, {transform_indices = @transform_6, window_bounds = array<i64: 1>}, {transform_indices = @transform_7, window_bounds = array<i64: 8, 1>}]} {
    %c0 = arith.constant 0 : index
    %c0_0 = arith.constant 0 : index
    %0 = vector.load %arg1[%c0, %c0_0] : memref<8x16xf32, #tpu.memory_space<vmem>>, vector<8x16xf32>
    %c0_1 = arith.constant 0 : index
    %c0_2 = arith.constant 0 : index
    %1 = vector.load %arg2[%c0_1, %c0_2] : memref<1x16xf32, #tpu.memory_space<vmem>>, vector<1x16xf32>
    %2 = vector.broadcast %1 : vector<1x16xf32> to vector<8x16xf32>
    %3 = arith.subf %0, %2 : vector<8x16xf32>
    %c0_3 = arith.constant 0 : index
    %c0_4 = arith.constant 0 : index
    %4 = vector.load %arg9[%c0_3, %c0_4] : memref<8x32xf32, #tpu.memory_space<vmem>>, vector<8x16xf32>
    tpu.vector_store %arg9[%c0_3, %c0_4], %3 {strides = array<i32>} : memref<8x32xf32, #tpu.memory_space<vmem>>, vector<8x16xf32>,
    %c0_5 = arith.constant 0 : index
    %c16 = arith.constant 16 : index
    %5 = vector.load %arg9[%c0_5, %c16] : memref<8x32xf32, #tpu.memory_space<vmem>>, vector<8x16xf32>
    tpu.vector_store %arg9[%c0_5, %c16], %0 {strides = array<i32>} : memref<8x32xf32, #tpu.memory_space<vmem>>, vector<8x16xf32>,
    %c0_6 = arith.constant 0 : index
    %c0_7 = arith.constant 0 : index
    %6 = vector.load %arg9[%c0_6, %c0_7] : memref<8x32xf32, #tpu.memory_space<vmem>>, vector<8x32xf32>
    %c0_8 = arith.constant 0 : index
    %c0_9 = arith.constant 0 : index
    %7 = vector.load %arg3[%c0_8, %c0_9] : memref<32x48xf32, #tpu.memory_space<vmem>>, vector<32x48xf32>
    %cst = arith.constant dense<0.000000e+00> : vector<8x48xf32>
    %8 = tpu.matmul %6, %7, %cst {dimension_numbers = #tpu.dot_dimension_numbers<[1], [0], [0], [1], [0, 0, 1, 1], [], []>} : vector<8x32xf32>, vector<32x48xf32>, vector<8x48xf32> -> vector<8x48xf32>
    %9 = math.absf %8 : vector<8x48xf32>
    %c0_10 = arith.constant 0 : index
    %c0_11 = arith.constant 0 : index
    %10 = vector.load %arg6[%c0_10, %c0_11] : memref<1x48xf32, #tpu.memory_space<vmem>>, vector<1x48xf32>
    %11 = vector.broadcast %10 : vector<1x48xf32> to vector<8x48xf32>
    %12 = arith.mulf %9, %11 : vector<8x48xf32>
    %cst_12 = arith.constant dense<0.000000e+00> : vector<8xf32>
    %13 = vector.multi_reduction <add>, %12, %cst_12 [1] : vector<8x48xf32> to vector<8xf32>
    %14 = vector.shape_cast %13 : vector<8xf32> to vector<8x1xf32>
    %c0_13 = arith.constant 0 : index
    %c0_14 = arith.constant 0 : index
    %15 = vector.load %arg4[%c0_13, %c0_14] : memref<1x48xf32, #tpu.memory_space<vmem>>, vector<1x48xf32>
    %16 = vector.broadcast %15 : vector<1x48xf32> to vector<8x48xf32>
    %17 = arith.addf %8, %16 : vector<8x48xf32>
    %cst_15 = arith.constant 0.000000e+00 : f32
    %18 = vector.broadcast %cst_15 : f32 to vector<8x48xf32>
    %19 = arith.maximumf %17, %18 : vector<8x48xf32>
    %c0_16 = arith.constant 0 : index
    %c0_17 = arith.constant 0 : index
    %20 = vector.load %arg5[%c0_16, %c0_17] : memref<1x48xf32, #tpu.memory_space<vmem>>, vector<1x48xf32>
    %21 = vector.broadcast %20 : vector<1x48xf32> to vector<8x48xf32>
    %22 = arith.mulf %19, %21 : vector<8x48xf32>
    %cst_18 = arith.constant dense<0.000000e+00> : vector<8xf32>
    %23 = vector.multi_reduction <add>, %22, %cst_18 [1] : vector<8x48xf32> to vector<8xf32>
    %24 = vector.shape_cast %23 : vector<8xf32> to vector<8x1xf32>
    %c0_19 = arith.constant 0 : index
    %25 = memref.load %arg7[%c0_19] : memref<1xf32, #tpu.memory_space<smem>>
    %26 = vector.broadcast %25 : f32 to vector<8x1xf32>
    %27 = arith.addf %24, %26 : vector<8x1xf32>
    %cst_20 = arith.constant 1.000000e+00 : f32
    %28 = vector.broadcast %cst_20 : f32 to vector<8x1xf32>
    %29 = arith.mulf %28, %14 : vector<8x1xf32>
    %30 = math.absf %27 : vector<8x1xf32>
    %cst_21 = arith.constant 1.000000e+00 : f32
    %31 = vector.broadcast %cst_21 : f32 to vector<8x1xf32>
    %32 = arith.mulf %31, %30 : vector<8x1xf32>
    %33 = arith.addf %29, %32 : vector<8x1xf32>
    %c0_22 = arith.constant 0 : index
    %c0_23 = arith.constant 0 : index
    %34 = vector.load %arg8[%c0_22, %c0_23] : memref<8x1xf32, #tpu.memory_space<vmem>>, vector<8x1xf32>
    tpu.vector_store %arg8[%c0_22, %c0_23], %33 {strides = array<i32>} : memref<8x1xf32, #tpu.memory_space<vmem>>, vector<8x1xf32>,
    return
  }
  func.func @transform_0(%arg0: i32) -> (i32, i32) {
    %c0_i32 = arith.constant 0 : i32
    %c0_i32_0 = arith.constant 0 : i32
    return %arg0, %c0_i32 : i32, i32
  }
  func.func @transform_1(%arg0: i32) -> (i32, i32) {
    %c0_i32 = arith.constant 0 : i32
    %c0_i32_0 = arith.constant 0 : i32
    %c0_i32_1 = arith.constant 0 : i32
    return %c0_i32, %c0_i32_0 : i32, i32
  }
  func.func @transform_2(%arg0: i32) -> (i32, i32) {
    %c0_i32 = arith.constant 0 : i32
    %c0_i32_0 = arith.constant 0 : i32
    %c0_i32_1 = arith.constant 0 : i32
    return %c0_i32, %c0_i32_0 : i32, i32
  }
  func.func @transform_3(%arg0: i32) -> (i32, i32) {
    %c0_i32 = arith.constant 0 : i32
    %c0_i32_0 = arith.constant 0 : i32
    %c0_i32_1 = arith.constant 0 : i32
    return %c0_i32, %c0_i32_0 : i32, i32
  }
  func.func @transform_4(%arg0: i32) -> (i32, i32) {
    %c0_i32 = arith.constant 0 : i32
    %c0_i32_0 = arith.constant 0 : i32
    %c0_i32_1 = arith.constant 0 : i32
    return %c0_i32, %c0_i32_0 : i32, i32
  }
  func.func @transform_5(%arg0: i32) -> (i32, i32) {
    %c0_i32 = arith.constant 0 : i32
    %c0_i32_0 = arith.constant 0 : i32
    %c0_i32_1 = arith.constant 0 : i32
    return %c0_i32, %c0_i32_0 : i32, i32
  }
  func.func @transform_6(%arg0: i32) -> i32 {
    %c0_i32 = arith.constant 0 : i32
    %c0_i32_0 = arith.constant 0 : i32
    return %c0_i32 : i32
  }
  func.func @transform_7(%arg0: i32) -> (i32, i32) {
    %c0_i32 = arith.constant 0 : i32
    %c0_i32_0 = arith.constant 0 : i32
    return %arg0, %c0_i32 : i32, i32
  }
}

</mosaic_0001>

<bundles_post_ra>
// kernel: tpu_custom_call.1
= control target key start
LH: loop header
LB: loop body
LE: loop exit
PB: predicated region body
PF: predicated region fallthrough
CT: control target
= control target key end

     0   :  { %13 = vsyncpa [#allocation5], 0  ;;  %s375_s0 = inlined_call_operand.hbm [shape: f32[8,16], index: 0, kind: input, shape index: {}]   ;;  %s376_s1 = inlined_call_operand.vmem [shape: f32[1,16], index: 1, kind: input, shape index: {}]   ;;  %s377_s2 = inlined_call_operand.hbm [shape: f32[32,48], index: 2, kind: input, shape index: {}]   ;;  %s378_s3 = inlined_call_operand.vmem [shape: f32[1,48], index: 3, kind: input, shape index: {}]   ;;  %s379_s4 = inlined_call_operand.vmem [shape: f32[1,48], index: 4, kind: input, shape index: {}]   ;;  %s380_s5 = inlined_call_operand.vmem [shape: f32[1,48], index: 5, kind: input, shape index: {}]   ;;  %s381_s6 = inlined_call_operand.<no memory space> [shape: f32[1], index: 6, kind: input, shape index: {}]   ;;  %s382_s7 = inlined_call_operand.vmem [shape: f32[8,1], index: 7, kind: output, shape index: {}]  }
   0x1   :  { %14 = vsyncpa [#allocation7], 0  ;;  %s278_s24 = smov [#allocation4]   ;;  %s279_s26 = smov [#allocation6]  }
   0x2   :  { %s21_s25 = sshll.u32 %s278_s24, 4  ;;  %s32_s27 = sshll.u32 %s279_s26, 4  ;;  %s22_s25 = int_to_ptr.vmem [resolvable:$true] %s21_s25  ;;  %s326_s27 = int_to_ptr.vmem [resolvable:$true] %s32_s27 }
   0x3   :  { %s230_s30 = scalar_lea.hbm %s375_s0, 128 }
   0x4   :  { %p231_p0 = scmp.ne.s32.totalorder %s375_s0, %s230_s30  ;;  %p234_p1 = scmp.lt.u32.totalorder %s230_s30, %s375_s0 }
   0x6   :  { %p236_p2 = pnand %p234_p1, %p231_p0 }
   0x8   :  { %239 = shalt.err (!%p236_p2)
}
   0x9   :  { %s240_s12 = scalar_lea.vmem %s22_s25, 128  ;;  %p245_p4 = scmp.lt.s32.totalorder %s22_s25, %s22_s25 }
   0xa   :  { %p241_p3 = scmp.ne.s32.totalorder %s22_s25, %s240_s12  ;;  %p246_p5 = scmp.lt.s32.totalorder %s240_s12, %s240_s12 }
   0xc   :  { %p247_p6 = por %p246_p5, %p245_p4 }
   0xe   :  { %p248_p7 = pnand %p247_p6, %p241_p3 }
  0x10   :  { %251 = shalt.err (!%p248_p7)
}
  0x11   :  { %24 = dma.hbm_to_vmem [thread:$0]  %s375_s0, 128, %s22_s25, [#allocation5]  }
  0x12   :  { %s252_s17 = scalar_lea.hbm %s377_s2, 512 }
  0x13   :  { %p253_p8 = scmp.ne.s32.totalorder %s377_s2, %s252_s17  ;;  %p256_p9 = scmp.lt.u32.totalorder %s252_s17, %s377_s2 }
  0x15   :  { %p258_p10 = pnand %p256_p9, %p253_p8 }
  0x17   :  { %261 = shalt.err (!%p258_p10)
}
  0x18   :  { %s262_s22 = scalar_lea.vmem %s326_s27, 512  ;;  %p267_p12 = scmp.lt.s32.totalorder %s326_s27, %s326_s27 }
  0x19   :  { %p263_p11 = scmp.ne.s32.totalorder %s326_s27, %s262_s22  ;;  %p268_p13 = scmp.lt.s32.totalorder %s262_s22, %s262_s22 }
  0x1b   :  { %p269_p0 = por %p268_p13, %p267_p12 }
  0x1d   :  { %p270_p1 = pnand %p269_p0, %p263_p11 }
  0x1f   :  { %273 = shalt.err (!%p270_p1)
}
  0x20   :  { %s280_s0 = smov 128   ;;  %s281_s23 = smov 8  }
  0x21   :  { %38 = dma.hbm_to_vmem [thread:$0]  %s377_s2, 512, %s326_s27, [#allocation7], %s280_s0, %s280_s0, %s281_s23  }
  0x22   :  { %274 = dma.done.wait [#allocation5], 128  }
  0x23   :  { %275 = vsyncadd [#allocation5], 4294967168 }
  0x24   :  { %276 = dma.done.wait [#allocation7], 512  }
  0x25   :  { %277 = vsyncadd [#allocation7], 4294966784  ;;  %v282_v0 = vmov 0.0|0.0   ;;  %vm283_vm0 = vmmov 0   ;;  %v284_v1 = vmov 0.0   ;;  %v53_v2 = vld [vmem:[#allocation4] sm:$0xff]  ;;  %v183_v25 = vstv %s381_s6 }
  0x26   :  { %216 = vmatprep.subr.bf16.mxu0 %v282_v0  ;;  %213 = vmatprep.mubr.msk.f32.mxu0 %vm283_vm0, %v284_v1  ;;  %v195_v3 = vld [vmem:[%s376_s1] ss:$0 sm:$0xff]  ;;  %vm62_vm1 = vcmask 130048   ;;  %v71_v4 = vld [vmem:[#allocation6] sm:$0xff]  ;;  %s285_s29 = smov 16   ;;  %v72_v6 = vld [vmem:[#allocation6 + $0x8] sm:$0xff] }
  0x27   :  { %65 = vrot.lane.b32.xlu0 %v53_v2, %s285_s29  ;;  %v61_v5 = vsub.f32 %v53_v2, %v195_v3  ;;  %v73_v7 = vld [vmem:[#allocation6 + $0x10] sm:$0xff]  ;;  %v74_v8 = vld [vmem:[#allocation6 + $0x18] sm:$0xff]  ;;  %v217_v9 = vpack.c.bf16 %v72_v6, %v71_v4  ;;  %vm68_vm2 = vcmask 261248   ;;  %vm75_vm3 = vcmask 261120  }
  0x28   :  { %v220_v10 = vpack.c.bf16 %v74_v8, %v73_v7  ;;  %v198_v13 = vld [vmem:[%s378_s3] ss:$0 sm:$0xff]  ;;  %vm158_vm4 = vcmask 392192   ;;  %vm187_vm5 = vcmask 7168  }
  0x29   :  { %63 = vst.msk [vmem:[#allocation2] sm:$0xff] %vm62_vm1, %v61_v5  ;;  %218 = vmatpush3.bf16.msra.mxu0 %v217_v9  ;;  %v197_v15 = vld [vmem:[%s380_s5] ss:$0 sm:$0xff] }
  0x2a   :  { %219 = vmatprep.subr.bf16.mxu0 %v282_v0  ;;  %v199_v19 = vld [vmem:[%s379_s4] ss:$0 sm:$0xff] }
  0x2d   :  { %221 = vmatpush3.bf16.msra.mxu0 %v220_v10 }
  0x99   :  { %v66_v11 = vpop.permute.xlu0 %65 }
  0x9a   :  { %69 = vst.msk [vmem:[#allocation2] sm:$0xff] %vm68_vm2, %v66_v11 }
  0xa1   :  { %v70_v12 = vld [vmem:[#allocation2] sm:$0xff] }
  0xa2   :  { %214 = vmatmul.mubr.msk.f32.vlgmr.msra.gmra.mrb[0].mxu0 %vm75_vm3, %v70_v12 }
 0x175   :  { %v145_v14 = vpop.f32.mrb[0].mxu0 }
 0x176   :  { %v149_v16 = vand.u32 2147483647, %v145_v14  ;;  %v169_v17 = vadd.f32 %v198_v13, %v145_v14  ;;  %v215_v18 = vpop.f32.mrb[1].mxu0 }
 0x178   :  { %v170_v20 = vmax.f32 %v169_v17, 0.0  ;;  %v157_v21 = vmul.f32 %v197_v15, %v149_v16 }
 0x17a   :  { %v159_v22 = vsel %vm158_vm4, %v157_v21, 0.0  ;;  %v178_v23 = vmul.f32 %v199_v19, %v170_v20 }
 0x17b   :  { %160 = vadd.xlane.f32.xlu1 %v159_v22 }
 0x17c   :  { %v179_v24 = vsel %vm158_vm4, %v178_v23, 0.0 }
 0x17d   :  { %180 = vadd.xlane.f32.xlu0 %v179_v24 }
 0x208   :  { %v161_v29 = vpop.xlane.xlu1 %160 }
 0x20a   :  { %v181_v26 = vpop.xlane.xlu0 %180 }
 0x20b   :  { %v184_v27 = vadd.f32 %v183_v25, %v181_v26 }
 0x20d   :  { %v185_v28 = vand.u32 2147483647, %v184_v27 }
 0x20f   :  { %v186_v30 = vadd.f32 %v185_v28, %v161_v29 }
 0x211   :  { %188 = vst.msk [vmem:[%s382_s7] sm:$0xff] %vm187_vm5, %v186_v30 }
 0x212   :  { %193 = vsyncpa [#allocation5], 1 }
 0x213   :  { %194 = vsyncpa [#allocation7], 1 }

</bundles_post_ra>
